<compile_context>
chip_gen: v7x
topology: tpu7x:2x2x1
jax: 0.10.0
libtpu: 0.0.40
codegen_flags: <defaults>
</compile_context>

<pallas_src>
import functools
import math

import jax
import jax.numpy as jnp
from jax.experimental import pallas as pl
from jax.experimental.pallas import tpu as pltpu

_LANES = 128


def _make_pe_table(d_model: int, max_len: int) -> jnp.ndarray:
    """Deterministic positional-encoding buffer, identical to the PyTorch init."""
    position = jnp.arange(max_len, dtype=jnp.float32)[:, None]            # (max_len, 1)
    div_term = jnp.exp(
        jnp.arange(0, d_model, 2, dtype=jnp.float32) * -(math.log(10000.0) / d_model)
    )                                                                      # (d_model/2,)
    angles = position * div_term                                           # (max_len, d_model/2)
    pe = jnp.zeros((max_len, 1, d_model), dtype=jnp.float32)
    pe = pe.at[:, 0, 0::2].set(jnp.sin(angles))
    pe = pe.at[:, 0, 1::2].set(jnp.cos(angles))
    return pe


# --------------------------------------------------------------------------- kernels
def _posenc_eval_kernel(x_ref, pe_ref, o_ref, *, batch, d):
    # x_ref: (TS, BD_pad) VMEM   pe_ref: (TS, D) fp32 VMEM
    pe_tile = pe_ref[...]                                   # fp32
    for b in range(batch):                                  # static unroll, zero-cost views
        sl = slice(b * d, (b + 1) * d)
        y = x_ref[:, sl].astype(jnp.float32) + pe_tile      # fp32 add, like the torch module
        o_ref[:, sl] = y.astype(o_ref.dtype)


def _posenc_train_kernel(seed_ref, x_ref, pe_ref, o_ref, *,
                         batch, d, drop_threshold, inv_keep):
    # Per-tile PRNG stream; (seed, tile_id) pair avoids overlap between adjacent seeds.
    pltpu.prng_seed(seed_ref[0], pl.program_id(0))
    pe_tile = pe_ref[...]                                   # fp32
    for b in range(batch):
        sl = slice(b * d, (b + 1) * d)
        y = x_ref[:, sl].astype(jnp.float32) + pe_tile
        bits = pltpu.prng_random_bits(y.shape)              # only a (TS, D) temp at a time
        # Integer-domain threshold: 31 uniform bits in [0, 2**31); drop iff r < p*2**31.
        r = pltpu.bitcast(bits, jnp.int32) & jnp.int32(0x7FFFFFFF)
        keep = r >= jnp.int32(drop_threshold)
        o_ref[:, sl] = jnp.where(keep, y * jnp.float32(inv_keep), 0.0).astype(o_ref.dtype)


# --------------------------------------------------------------------------- sizing
def _vmem_limit_bytes() -> int:
    """Generation-aware VMEM limit: 3/4 of physical (v5e/v6e ~96 MiB, v7x 48 MiB)."""
    cap = 64 << 20  # conservative fallback = v7x per-TC physical VMEM
    try:
        info = pltpu.get_tpu_info()
        c = int(getattr(info, "vmem_capacity_bytes", 0))
        if c > 0:
            cap = c
    except Exception:
        pass
    return min((cap * 3) // 4, 100 << 20)


def _sublane_pack(dtype) -> int:
    return max(8, 32 // jnp.dtype(dtype).itemsize)          # 8 f32, 16 bf16, 32 int8/fp8


def _choose_tile_rows(seq_len, bd_pad, d, dtype, training, vmem_limit) -> int:
    """Largest sequence tile that fits the (double-buffered) VMEM budget."""
    itemsize = jnp.dtype(dtype).itemsize
    per_row = 4 * bd_pad * itemsize        # 2x double-buffered x tile + 2x out tile
    per_row += 2 * d * 4                   # double-buffered fp32 pe tile
    per_row += (16 if training else 8) * d  # slice-sized fp32/u32 temporaries
    budget = max(vmem_limit - (6 << 20), 1 << 20)            # headroom for compiler scratch
    ts = max(1, budget // per_row)
    if ts >= seq_len:
        return seq_len                     # one block covers the whole sequence
    pack = _sublane_pack(dtype)
    return max(pack, (ts // pack) * pack)


# --------------------------------------------------------------------------- wrapper
def positional_encoding_forward(x, pe, *, dropout_p=0.1, training=False, seed=0):
    """x: (S, B, D); pe: (max_len, 1, D).  Returns dropout(x + pe[:S])."""
    S, B, D = x.shape
    BD = B * D
    pad_cols = (-BD) % _LANES
    BD_pad = BD + pad_cols

    # Lane-dense layout: collapse (S, B, D) -> (S, B*D); pad last dim to a 128 multiple
    # so every store is an unmasked full-lane vst.  pe stays (S, D), kept in fp32.
    x2 = x.reshape(S, BD)
    if pad_cols:
        x2 = jnp.pad(x2, ((0, 0), (0, pad_cols)))
    pe2 = pe[:S, 0, :].astype(jnp.float32)

    do_dropout = training and dropout_p > 0.0
    if do_dropout and not (0.0 <= dropout_p < 1.0):
        raise ValueError("dropout_p must be in [0, 1)")

    vmem_limit = _vmem_limit_bytes()
    ts = _choose_tile_rows(S, BD_pad, D, x.dtype, do_dropout, vmem_limit)
    grid = (pl.cdiv(S, ts),)

    x_spec = pl.BlockSpec((ts, BD_pad), lambda i: (i, 0))
    pe_spec = pl.BlockSpec((ts, D), lambda i: (i, 0))
    out_spec = pl.BlockSpec((ts, BD_pad), lambda i: (i, 0))

    compiler_params = pltpu.CompilerParams(
        dimension_semantics=("parallel",),          # lets v7x shard tiles across 2 TCs
        vmem_limit_bytes=int(vmem_limit),
    )
    cost = pl.CostEstimate(
        flops=S * BD,
        transcendentals=0,
        bytes_accessed=(2 * S * BD) * x.dtype.itemsize + S * D * 4,
    )

    if do_dropout:
        kernel = functools.partial(
            _posenc_train_kernel,
            batch=B,
            d=D,
            drop_threshold=int(round(float(dropout_p) * (1 << 31))),
            inv_keep=1.0 / (1.0 - float(dropout_p)),
        )
        seed_arr = jnp.array([seed], dtype=jnp.int32)
        out2 = pl.pallas_call(
            kernel,
            out_shape=jax.ShapeDtypeStruct((S, BD_pad), x.dtype),
            grid_spec=pltpu.PrefetchScalarGridSpec(
                num_scalar_prefetch=0,
                grid=grid,
                in_specs=[
                    pl.BlockSpec(memory_space=pltpu.MemorySpace.SMEM),  # seed scalar
                    x_spec,
                    pe_spec,
                ],
                out_specs=out_spec,
            ),
            compiler_params=compiler_params,
            cost_estimate=cost,
        )(seed_arr, x2, pe2)
    else:
        # Eval mode: dropout is identity (module.eval()) -> pure 2-in/1-out streaming add.
        kernel = functools.partial(_posenc_eval_kernel, batch=B, d=D)
        out2 = pl.pallas_call(
            kernel,
            out_shape=jax.ShapeDtypeStruct((S, BD_pad), x.dtype),
            grid_spec=pltpu.PrefetchScalarGridSpec(
                num_scalar_prefetch=0,
                grid=grid,
                in_specs=[x_spec, pe_spec],
                out_specs=out_spec,
            ),
            compiler_params=compiler_params,
            cost_estimate=cost,
        )(x2, pe2)

    if pad_cols:
        out2 = out2[:, :BD]
    return out2.reshape(S, B, D)


# --------------------------------------------------------------------------- demo
if __name__ == "__main__":
    d_model = 32
    max_len = 64
    seq_len = 8
    batch = 2

    key = jax.random.PRNGKey(0)
    x = jax.random.normal(key, (seq_len, batch, d_model), dtype=jnp.float32)
    pe = _make_pe_table(d_model, max_len)

    # Eval-mode forward (dropout is identity), matching module.eval() semantics.
    out = positional_encoding_forward(x, pe, dropout_p=0.1, training=False)
    out = jax.block_until_ready(out)

    ref = x + pe[:seq_len]
    assert out.shape == (seq_len, batch, d_model)
    assert jnp.allclose(out, ref, atol=1e-6), "mismatch vs reference"

    # Training-mode dropout uses the TPU hardware PRNG (pltpu.prng_*), which has
    # no CPU / interpret-mode lowering, so only exercise it on a real TPU backend.
    if jax.devices()[0].platform == "tpu":
        p = 0.1
        out_train = positional_encoding_forward(
            x, pe, dropout_p=p, training=True, seed=1234
        )
        out_train = jax.block_until_ready(out_train)
        assert out_train.shape == (seq_len, batch, d_model)
        # Each element is either dropped (0) or (x + pe) / (1 - p).
        scaled = ref / (1.0 - p)
        ok = jnp.all(
            jnp.isclose(out_train, 0.0, atol=1e-6)
            | jnp.isclose(out_train, scaled, atol=1e-5, rtol=1e-5)
        )
        assert bool(ok), "training-mode output is not an inverted-dropout of x+pe"

    print("KERNEL_OK")
</pallas_src>

<mosaic_0001>
module attributes {stable_mosaic.version = 11 : i64} {
  func.func @_posenc_eval_kernel(%arg0: i32, %arg1: memref<8x128xf32, #tpu.memory_space<vmem>>, %arg2: memref<8x32xf32, #tpu.memory_space<vmem>>, %arg3: memref<8x128xf32, #tpu.memory_space<vmem>>) attributes {dimension_semantics = [#tpu.dimension_semantics<parallel>], iteration_bounds = array<i64: 1>, scalar_prefetch = 0 : i64, scratch_operands = 0 : i64, tpu.core_type = #tpu.core_type<tc>, window_params = [{transform_indices = @transform_0, window_bounds = array<i64: 8, 128>}, {transform_indices = @transform_1, window_bounds = array<i64: 8, 32>}, {transform_indices = @transform_2, window_bounds = array<i64: 8, 128>}]} {
    %c0 = arith.constant 0 : index
    %c0_0 = arith.constant 0 : index
    %0 = vector.load %arg2[%c0, %c0_0] : memref<8x32xf32, #tpu.memory_space<vmem>>, vector<8x32xf32>
    %c0_1 = arith.constant 0 : index
    %c0_2 = arith.constant 0 : index
    %1 = vector.load %arg1[%c0_1, %c0_2] : memref<8x128xf32, #tpu.memory_space<vmem>>, vector<8x32xf32>
    %2 = arith.addf %1, %0 : vector<8x32xf32>
    %c0_3 = arith.constant 0 : index
    %c0_4 = arith.constant 0 : index
    %3 = vector.load %arg3[%c0_3, %c0_4] : memref<8x128xf32, #tpu.memory_space<vmem>>, vector<8x32xf32>
    tpu.vector_store %arg3[%c0_3, %c0_4], %2 {strides = array<i32>} : memref<8x128xf32, #tpu.memory_space<vmem>>, vector<8x32xf32>,
    %c0_5 = arith.constant 0 : index
    %c32 = arith.constant 32 : index
    %4 = vector.load %arg1[%c0_5, %c32] : memref<8x128xf32, #tpu.memory_space<vmem>>, vector<8x32xf32>
    %5 = arith.addf %4, %0 : vector<8x32xf32>
    %c0_6 = arith.constant 0 : index
    %c32_7 = arith.constant 32 : index
    %6 = vector.load %arg3[%c0_6, %c32_7] : memref<8x128xf32, #tpu.memory_space<vmem>>, vector<8x32xf32>
    tpu.vector_store %arg3[%c0_6, %c32_7], %5 {strides = array<i32>} : memref<8x128xf32, #tpu.memory_space<vmem>>, vector<8x32xf32>,
    return
  }
  func.func @transform_0(%arg0: i32) -> (i32, i32) {
    %c0_i32 = arith.constant 0 : i32
    %c0_i32_0 = arith.constant 0 : i32
    return %arg0, %c0_i32 : i32, i32
  }
  func.func @transform_1(%arg0: i32) -> (i32, i32) {
    %c0_i32 = arith.constant 0 : i32
    %c0_i32_0 = arith.constant 0 : i32
    return %arg0, %c0_i32 : i32, i32
  }
  func.func @transform_2(%arg0: i32) -> (i32, i32) {
    %c0_i32 = arith.constant 0 : i32
    %c0_i32_0 = arith.constant 0 : i32
    return %arg0, %c0_i32 : i32, i32
  }
}

</mosaic_0001>

<bundles_post_ra>
// kernel: tpu_custom_call.1
= control target key start
LH: loop header
LB: loop body
LE: loop exit
PB: predicated region body
PF: predicated region fallthrough
CT: control target
= control target key end

     0   :  { %7 = vsyncpa [#allocation3], 0  ;;  %s196_s0 = inlined_call_operand.hbm [shape: f32[8,128], index: 0, kind: input, shape index: {}]   ;;  %s197_s1 = inlined_call_operand.hbm [shape: f32[8,32], index: 1, kind: input, shape index: {}]   ;;  %s198_s2 = inlined_call_operand.hbm [shape: f32[8,128], index: 2, kind: output, shape index: {}]  }
   0x1   :  { %8 = vsyncpa [#allocation6], 0 }
   0x2   :  { %9 = vsyncpa [#allocation4], 0  ;;  %s141_s9 = smov [#allocation2]   ;;  %s142_s11 = smov [#allocation5]  }
   0x3   :  { %s16_s10 = sshll.u32 %s141_s9, 4  ;;  %s26_s12 = sshll.u32 %s142_s11, 4  ;;  %s17_s10 = int_to_ptr.vmem [resolvable:$true] %s16_s10  ;;  %s27_s12 = int_to_ptr.vmem [resolvable:$true] %s26_s12 }
   0x4   :  { %s69_s15 = scalar_lea.hbm %s196_s0, 128 }
   0x5   :  { %p70_p0 = scmp.ne.s32.totalorder %s196_s0, %s69_s15  ;;  %p73_p1 = scmp.lt.u32.totalorder %s69_s15, %s196_s0 }
   0x7   :  { %p75_p2 = pnand %p73_p1, %p70_p0 }
   0x9   :  { %78 = shalt.err (!%p75_p2)
}
   0xa   :  { %s79_s20 = scalar_lea.vmem %s17_s10, 128  ;;  %p84_p4 = scmp.lt.s32.totalorder %s17_s10, %s17_s10 }
   0xb   :  { %p80_p3 = scmp.ne.s32.totalorder %s17_s10, %s79_s20  ;;  %p85_p5 = scmp.lt.s32.totalorder %s79_s20, %s79_s20 }
   0xd   :  { %p86_p6 = por %p85_p5, %p84_p4 }
   0xf   :  { %p87_p7 = pnand %p86_p6, %p80_p3 }
  0x11   :  { %90 = shalt.err (!%p87_p7)
}
  0x12   :  { %19 = dma.hbm_to_vmem [thread:$0]  %s196_s0, 128, %s17_s10, [#allocation3]  }
  0x13   :  { %s91_s25 = scalar_lea.hbm %s197_s1, 128 }
  0x14   :  { %p92_p8 = scmp.ne.s32.totalorder %s197_s1, %s91_s25  ;;  %p95_p9 = scmp.lt.u32.totalorder %s91_s25, %s197_s1 }
  0x16   :  { %p97_p10 = pnand %p95_p9, %p92_p8 }
  0x18   :  { %100 = shalt.err (!%p97_p10)
}
  0x19   :  { %s101_s30 = scalar_lea.vmem %s27_s12, 128  ;;  %p106_p12 = scmp.lt.s32.totalorder %s27_s12, %s27_s12 }
  0x1a   :  { %p102_p11 = scmp.ne.s32.totalorder %s27_s12, %s101_s30  ;;  %p107_p13 = scmp.lt.s32.totalorder %s101_s30, %s101_s30 }
  0x1c   :  { %p108_p0 = por %p107_p13, %p106_p12 }
  0x1e   :  { %p109_p1 = pnand %p108_p0, %p102_p11 }
  0x20   :  { %112 = shalt.err (!%p109_p1)
}
  0x21   :  { %29 = dma.hbm_to_vmem [thread:$0]  %s197_s1, 128, %s27_s12, [#allocation6]  }
  0x22   :  { %135 = dma.done.wait [#allocation3], 128  }
  0x23   :  { %136 = vsyncadd [#allocation3], 4294967168 }
  0x24   :  { %137 = dma.done.wait [#allocation6], 128  }
  0x25   :  { %138 = vsyncadd [#allocation6], 4294967168  ;;  %v36_v0 = vld [vmem:[#allocation5] sm:$0xff]  ;;  %v37_v1 = vld [vmem:[#allocation2] sm:$0xff]  ;;  %vm39_vm0 = vcmask 261120   ;;  %s143_s4 = smov 32  }
  0x26   :  { %v38_v2 = vadd.f32 %v37_v1, %v36_v0  ;;  %43 = vrot.lane.b32.xlu0 %v36_v0, %s143_s4  ;;  %s144_s5 = smov [#allocation7]   ;;  %vm47_vm1 = vcmask 523520  }
  0x27   :  { %s55_s6 = sshll.u32 %s144_s5, 4  ;;  %s56_s6 = int_to_ptr.vmem [resolvable:$true] %s55_s6 }
  0x28   :  { %40 = vst.msk [vmem:[#allocation7] sm:$0xff] %vm39_vm0, %v38_v2  ;;  %s113_s7 = scalar_lea.vmem %s56_s6, 128  ;;  %p118_p3 = scmp.lt.s32.totalorder %s56_s6, %s56_s6 }
  0x29   :  { %p114_p2 = scmp.ne.s32.totalorder %s56_s6, %s113_s7  ;;  %p119_p4 = scmp.lt.s32.totalorder %s113_s7, %s113_s7 }
  0x2b   :  { %p120_p5 = por %p119_p4, %p118_p3 }
  0x2d   :  { %p121_p6 = pnand %p120_p5, %p114_p2 }
  0x98   :  { %v44_v3 = vpop.permute.xlu0 %43 }
  0x99   :  { %v46_v4 = vadd.f32 %v44_v3, %v37_v1 }
  0x9b   :  { %48 = vst.msk [vmem:[#allocation7] sm:$0xff] %vm47_vm1, %v46_v4 }
  0x9c   :  { %124 = shalt.err (!%p121_p6)
}
  0x9d   :  { %s125_s9 = scalar_lea.hbm %s198_s2, 128 }
  0x9e   :  { %p126_p7 = scmp.ne.s32.totalorder %s198_s2, %s125_s9  ;;  %p129_p8 = scmp.lt.u32.totalorder %s125_s9, %s198_s2 }
  0xa0   :  { %p131_p9 = pnand %p129_p8, %p126_p7 }
  0xa2   :  { %134 = shalt.err (!%p131_p9)
}
  0xa3   :  { %58 = dma.vmem_to_hbm [thread:$0]  %s56_s6, 128, %s198_s2, [#allocation4]  }
  0xa4   :  { %139 = dma.done.wait [#allocation4], 128  }
  0xa5   :  { %140 = vsyncadd [#allocation4], 4294967168 }
  0xa6   :  { %62 = vsyncpa [#allocation3], 1 }
  0xa7   :  { %63 = vsyncpa [#allocation6], 1 }
  0xa8   :  { %64 = vsyncpa [#allocation4], 1 }

</bundles_post_ra>
